<compile_context>
chip_gen: v5e
topology: v5e:2x2
jax: 0.10.0
libtpu: 0.0.40
codegen_flags: <defaults>
</compile_context>

<pallas_src>
import jax
import jax.numpy as jnp
from jax import lax
from jax.experimental import pallas as pl
from jax.experimental.pallas import tpu as pltpu


def _round_up(v, m):
    return ((v + m - 1) // m) * m


# ---------------------------------------------------------------------------
# Path 1: table resident in VMEM; gather T tokens per step via one-hot matmul.
# ---------------------------------------------------------------------------
def _resident_gather_kernel(ids_ref, table_ref, out_ref):
    ids = ids_ref[...]                                   # (T, 1) int32 token ids
    t_blk = ids.shape[0]
    vocab = table_ref.shape[0]
    pos = lax.broadcasted_iota(jnp.int32, (t_blk, vocab), 1)   # (T, vocab)
    onehot = (pos == ids).astype(table_ref.dtype)              # (T, vocab)
    out_ref[...] = jnp.dot(
        onehot, table_ref[...], preferred_element_type=jnp.float32
    ).astype(out_ref.dtype)


# ---------------------------------------------------------------------------
# Path 2: table stays in HBM; per-row DMAs into VMEM scratch, dense writeback.
# ---------------------------------------------------------------------------
def _hbm_gather_kernel(idx_ref, table_hbm, out_ref, rows_vmem, copy_sem):
    t_blk = rows_vmem.shape[0]
    base = pl.program_id(0) * t_blk

    # Issue all T row copies; they accumulate on a single DMA semaphore so the
    # tiny random-row reads stay in flight concurrently.
    def _issue(t, carry):
        row = idx_ref[base + t]
        pltpu.make_async_copy(
            table_hbm.at[pl.ds(row, 1), :],
            rows_vmem.at[pl.ds(t, 1), :],
            copy_sem.at[0],
        ).start()
        return carry

    lax.fori_loop(0, t_blk, _issue, 0)

    # Drain: one wait per issued row copy (same transfer size per wait).
    def _wait(t, carry):
        pltpu.make_async_copy(
            table_hbm.at[pl.ds(0, 1), :],
            rows_vmem.at[pl.ds(t, 1), :],
            copy_sem.at[0],
        ).wait()
        return carry

    lax.fori_loop(0, t_blk, _wait, 0)

    # Dense (T, dim) tile; Pallas pipelining overlaps its HBM writeback with
    # the next block's body.
    out_ref[...] = rows_vmem[...]


# ---------------------------------------------------------------------------
# Wrapper
# ---------------------------------------------------------------------------
def word_embedding_forward(x, table, *, block_tokens=256,
                           resident_table_bytes=2 * 1024 * 1024,
                           force_hbm_gather=False):
    """Pallas equivalent of WordEmbedding.forward: out[b, s] = table[x[b, s]]."""
    batch, seq = x.shape
    vocab, dim = table.shape

    flat_idx = x.reshape(-1).astype(jnp.int32)
    # torch raises on out-of-range ids; clamp instead to avoid OOB DMAs.
    flat_idx = jnp.clip(flat_idx, 0, vocab - 1)
    n = flat_idx.shape[0]

    # Tokens per grid step: multiple of 8 (sublane-full output tiles), small
    # enough that ~3 (T, dim) tiles (gather scratch + double-buffered output)
    # fit a conservative 8 MiB VMEM budget (OK on v5e / v6e / v7x defaults).
    bytes_per_row = dim * table.dtype.itemsize
    max_t_vmem = max(8, ((8 * 1024 * 1024) // (3 * bytes_per_row)) // 8 * 8)
    t_blk = max(8, min(_round_up(block_tokens, 8), max_t_vmem, _round_up(n, 8)))

    n_pad = _round_up(n, t_blk)
    if n_pad != n:
        # Pad with token 0 (the padding row); extra rows are sliced off below.
        flat_idx = jnp.concatenate(
            [flat_idx, jnp.zeros((n_pad - n,), dtype=jnp.int32)])
    num_blocks = n_pad // t_blk

    table_bytes = vocab * dim * table.dtype.itemsize
    use_resident = (table_bytes <= resident_table_bytes and vocab <= 4096
                    and not force_hbm_gather)

    if use_resident:
        ids_2d = flat_idx.reshape(n_pad, 1)
        out_flat = pl.pallas_call(
            _resident_gather_kernel,
            out_shape=jax.ShapeDtypeStruct((n_pad, dim), table.dtype),
            grid=(num_blocks,),
            in_specs=[
                pl.BlockSpec((t_blk, 1), lambda i: (i, 0)),
                # Same block every step => the table is DMA'd to VMEM once and
                # stays resident across the whole grid.
                pl.BlockSpec((vocab, dim), lambda i: (0, 0)),
            ],
            out_specs=pl.BlockSpec((t_blk, dim), lambda i: (i, 0)),
            compiler_params=pltpu.CompilerParams(
                dimension_semantics=("parallel",)),
        )(ids_2d, table)
    else:
        out_flat = pl.pallas_call(
            _hbm_gather_kernel,
            out_shape=jax.ShapeDtypeStruct((n_pad, dim), table.dtype),
            grid_spec=pltpu.PrefetchScalarGridSpec(
                num_scalar_prefetch=1,                         # flat_idx -> SMEM
                grid=(num_blocks,),
                in_specs=[pl.BlockSpec(memory_space=pl.ANY)],  # table stays in HBM
                out_specs=pl.BlockSpec((t_blk, dim), lambda i, idx: (i, 0)),
                scratch_shapes=[
                    pltpu.VMEM((t_blk, dim), table.dtype),
                    pltpu.SemaphoreType.DMA((1,)),
                ],
            ),
            compiler_params=pltpu.CompilerParams(
                dimension_semantics=("parallel",)),
        )(flat_idx, table)

    if n_pad != n:
        out_flat = out_flat[:n]
    return out_flat.reshape(batch, seq, dim)


if __name__ == "__main__":
    # Small, deterministic setup consistent with the module's __init__.
    vocab, dim = 64, 128
    batch, seq = 2, 8

    key = jax.random.PRNGKey(0)
    k_w, k_x = jax.random.split(key)

    # nn.Embedding default init ~ N(0, 1); padding_idx=0 row is zeroed at init.
    table = jax.random.normal(k_w, (vocab, dim), dtype=jnp.float32)
    table = table.at[0].set(0.0)

    # Token ids (LongTensor in PyTorch -> int32 here), including padding (0).
    x = jax.random.randint(k_x, (batch, seq), 0, vocab, dtype=jnp.int32)
    x = x.at[0, 0].set(0)  # exercise the padding_idx path

    ref = table[x]  # plain JAX gather reference

    # Fast path: table resident in VMEM, one-hot MXU gather.
    out_resident = jax.block_until_ready(word_embedding_forward(x, table))
    assert out_resident.shape == (batch, seq, dim), out_resident.shape
    assert out_resident.dtype == jnp.float32
    assert jnp.allclose(out_resident, ref), "resident path mismatch vs reference"
    assert jnp.all(out_resident[0, 0] == 0.0), "padding row should be zeros"

    # General path: table in HBM, per-row DMA gather (forced here for coverage).
    out_hbm = jax.block_until_ready(
        word_embedding_forward(x, table, force_hbm_gather=True))
    assert out_hbm.shape == (batch, seq, dim), out_hbm.shape
    assert jnp.allclose(out_hbm, ref), "HBM gather path mismatch vs reference"
    assert jnp.all(out_hbm[0, 0] == 0.0), "padding row should be zeros"

    print("KERNEL_OK")
</pallas_src>

<mosaic_0001>
module attributes {stable_mosaic.version = 11 : i64} {
  func.func @_resident_gather_kernel(%arg0: i32, %arg1: memref<16x1xi32, #tpu.memory_space<vmem>>, %arg2: memref<64x128xf32, #tpu.memory_space<vmem>>, %arg3: memref<16x128xf32, #tpu.memory_space<vmem>>) attributes {dimension_semantics = [#tpu.dimension_semantics<parallel>], iteration_bounds = array<i64: 1>, scalar_prefetch = 0 : i64, scratch_operands = 0 : i64, tpu.core_type = #tpu.core_type<tc>, window_params = [{transform_indices = @transform_0, window_bounds = array<i64: 16, 1>}, {pipeline_mode = #tpu.pipeline_mode<synchronous>, transform_indices = @transform_1, window_bounds = array<i64: 64, 128>}, {transform_indices = @transform_2, window_bounds = array<i64: 16, 128>}]} {
    %c0 = arith.constant 0 : index
    %c0_0 = arith.constant 0 : index
    %0 = vector.load %arg1[%c0, %c0_0] : memref<16x1xi32, #tpu.memory_space<vmem>>, vector<16x1xi32>
    %1 = tpu.iota {dimensions = array<i32: 1>} : vector<16x64xi32>
    %2 = vector.broadcast %0 : vector<16x1xi32> to vector<16x64xi32>
    %3 = arith.cmpi eq, %1, %2 : vector<16x64xi32>
    %4 = arith.extui %3 : vector<16x64xi1> to vector<16x64xi32>
    %5 = arith.sitofp %4 : vector<16x64xi32> to vector<16x64xf32>
    %c0_1 = arith.constant 0 : index
    %c0_2 = arith.constant 0 : index
    %6 = vector.load %arg2[%c0_1, %c0_2] : memref<64x128xf32, #tpu.memory_space<vmem>>, vector<64x128xf32>
    %cst = arith.constant dense<0.000000e+00> : vector<16x128xf32>
    %7 = tpu.matmul %5, %6, %cst {dimension_numbers = #tpu.dot_dimension_numbers<[1], [0], [0], [1], [0, 0, 1, 1], [], []>} : vector<16x64xf32>, vector<64x128xf32>, vector<16x128xf32> -> vector<16x128xf32>
    %c0_3 = arith.constant 0 : index
    %c0_4 = arith.constant 0 : index
    %8 = vector.load %arg3[%c0_3, %c0_4] : memref<16x128xf32, #tpu.memory_space<vmem>>, vector<16x128xf32>
    tpu.vector_store %arg3[%c0_3, %c0_4], %7 {strides = array<i32>} : memref<16x128xf32, #tpu.memory_space<vmem>>, vector<16x128xf32>,
    return
  }
  func.func @transform_0(%arg0: i32) -> (i32, i32) {
    %c0_i32 = arith.constant 0 : i32
    %c0_i32_0 = arith.constant 0 : i32
    return %arg0, %c0_i32 : i32, i32
  }
  func.func @transform_1(%arg0: i32) -> (i32, i32) {
    %c0_i32 = arith.constant 0 : i32
    %c0_i32_0 = arith.constant 0 : i32
    %c0_i32_1 = arith.constant 0 : i32
    return %c0_i32, %c0_i32_0 : i32, i32
  }
  func.func @transform_2(%arg0: i32) -> (i32, i32) {
    %c0_i32 = arith.constant 0 : i32
    %c0_i32_0 = arith.constant 0 : i32
    return %arg0, %c0_i32 : i32, i32
  }
}

</mosaic_0001>

<bundles_post_ra>
// kernel: tpu_custom_call.1
= control target key start
LH: loop header
LB: loop body
LE: loop exit
PB: predicated region body
PF: predicated region fallthrough
CT: control target
= control target key end

     0   :  { %7 = vsyncpa [#allocation3], 0  ;;  %s213_s0 = inlined_call_operand.vmem [shape: s32[16,1], index: 0, kind: input, shape index: {}]   ;;  %s214_s1 = inlined_call_operand.hbm [shape: f32[64,128], index: 1, kind: input, shape index: {}]   ;;  %s215_s2 = inlined_call_operand.hbm [shape: f32[16,128], index: 2, kind: output, shape index: {}]  }
   0x1   :  { %8 = vsyncpa [#allocation4], 0  ;;  %s15_s11 = sshll.u32 %s214_s1, 4  ;;  %s174_s12 = smov [#allocation2]   ;;  %s16_s11 = int_to_ptr.hbm [resolvable:$true] %s15_s11 }
   0x2   :  { %s17_s13 = sshll.u32 %s174_s12, 4  ;;  %s175_s14 = smov 128   ;;  %s18_s13 = int_to_ptr.vmem [resolvable:$true] %s17_s13 }
   0x3   :  { %s176_s15 = smov 8  }
   0x4   :  { %23 = dma.hbm_to_vmem [thread:$0]  %s16_s11, 1024, %s18_s13, [#allocation3], %s175_s14, %s175_s14, %s176_s15  }
   0x5   :  { %170 = dma.done.wait [#allocation3], 1024  }
   0x6   :  { %171 = vsyncadd [#allocation3], 4294966272  ;;  %v177_v0 = vmov 0   ;;  %v28_v1 = vld [vmem:[%s213_s0] sm:$0xff]  ;;  %v51_v2 = vld [vmem:[#allocation2 + $0x38] sm:$0xff]  ;;  %v30_v11 = vlaneseq  ;;  %vm52_vm0 = vcmask 523264  }
   0x7   :  { %121 = vset.pattern.permute.xlu0 %v177_v0  ;;  %67 = vmatpush.msra.mxu0 %v51_v2  ;;  %v50_v3 = vld [vmem:[#allocation2 + $0x30] sm:$0xff]  ;;  %v49_v4 = vld [vmem:[#allocation2 + $0x28] sm:$0xff]  ;;  %v48_v5 = vld [vmem:[#allocation2 + $0x20] sm:$0xff]  ;;  %v178_v14 = vmov 0.0   ;;  %s90_s22 = sshll.u32 %s215_s2, 4  ;;  %s91_s22 = int_to_ptr.hbm [resolvable:$true] %s90_s22 }
   0x8   :  { %33 = vperm.xlu0 %121, %v28_v1   ;;  %107 = vmatpush.msra.mxu1 %v51_v2  ;;  %v29_v6 = vld [vmem:[%s213_s0 + $0x8] sm:$0xff]  ;;  %v47_v7 = vld [vmem:[#allocation2 + $0x18] sm:$0xff]  ;;  %v46_v8 = vld [vmem:[#allocation2 + $0x10] sm:$0xff]  ;;  %v31_v12 = vand.u32 127, %v30_v11  ;;  %s179_s0 = smov [#allocation5]  }
   0x9   :  { %68 = vmatpush.msra.mxu0 %v50_v3  ;;  %v45_v9 = vld [vmem:[#allocation2 + $0x8] sm:$0xff]  ;;  %v44_v10 = vld [vmem:[#allocation2] sm:$0xff]  ;;  %s88_s19 = sshll.u32 %s179_s0, 4  ;;  %s89_s19 = int_to_ptr.vmem [resolvable:$true] %s88_s19 }
   0xa   :  { %108 = vmatpush.msra.mxu1 %v50_v3 }
   0xb   :  { %69 = vmatpush.msra.mxu0 %v49_v4 }
   0xc   :  { %109 = vmatpush.msra.mxu1 %v49_v4 }
   0xd   :  { %70 = vmatpush.msra.mxu0 %v48_v5 }
   0xe   :  { %110 = vmatpush.msra.mxu1 %v48_v5 }
   0xf   :  { %71 = vmatpush.msra.mxu0 %v47_v7 }
  0x10   :  { %36 = vperm.xlu0 %121, %v29_v6   ;;  %111 = vmatpush.msra.mxu1 %v47_v7 }
  0x11   :  { %72 = vmatpush.msra.mxu0 %v46_v8 }
  0x12   :  { %112 = vmatpush.msra.mxu1 %v46_v8 }
  0x13   :  { %73 = vmatpush.msra.mxu0 %v45_v9 }
  0x14   :  { %113 = vmatpush.msra.mxu1 %v45_v9 }
  0x15   :  { %74 = vmatpush.msra.mxu0 %v44_v10 }
  0x16   :  { %114 = vmatpush.msra.mxu1 %v44_v10 }
  0x7a   :  { %v34_v13 = vpop.permute.xlu0 %33 }
  0x7b   :  { %vm38_vm1 = vcmp.eq.s32.totalorder %v31_v12, %v34_v13 }
  0x7c   :  { %v103_v15 = vsel %vm38_vm1, 1.0, %v178_v14 }
  0x7d   :  { %105 = vmatmul.msk.f32.vlgmr.msra.gmra.mxu0 %vm52_vm0, %v103_v15 }
  0x82   :  { %v37_v16 = vpop.permute.xlu0 %36 }
  0x83   :  { %vm39_vm2 = vcmp.eq.s32.totalorder %v31_v12, %v37_v16 }
  0x84   :  { %v104_v17 = vsel %vm39_vm2, 1.0, %v178_v14 }
  0x85   :  { %106 = vmatmul.msk.f32.vlgmr.msra.gmra.mxu1 %vm52_vm0, %v104_v17 }
  0xfa   :  { %v76_v18 = vpop.f32.mrf.mxu0 }
  0xfb   :  { %82 = vst [vmem:[#allocation5] sm:$0xff] %v76_v18 }
 0x102   :  { %v79_v19 = vpop.f32.mrf.mxu1 }
 0x103   :  { %83 = vst [vmem:[#allocation5 + $0x8] sm:$0xff] %v79_v19 }
 0x104   :  { %96 = dma.vmem_to_hbm [thread:$0]  %s89_s19, 256, %s91_s22, [#allocation4], %s175_s14, %s175_s14, %s176_s15  }
 0x105   :  { %172 = dma.done.wait [#allocation4], 256  }
 0x106   :  { %173 = vsyncadd [#allocation4], 4294967040 }
 0x107   :  { %101 = vsyncpa [#allocation3], 1 }
 0x108   :  { %102 = vsyncpa [#allocation4], 1 }

</bundles_post_ra>
